<compile_context>
chip_gen: v7x
topology: tpu7x:2x2x1
jax: 0.10.0
libtpu: 0.0.40
codegen_flags: <defaults>
</compile_context>

<pallas_src>
import functools

import jax
import jax.numpy as jnp
from jax.experimental import pallas as pl
from jax.experimental.pallas import tpu as pltpu


# ------------------------------ helpers ---------------------------------------

def _round_up(x, m):
    return ((x + m - 1) // m) * m


def _pick_tile(target, padded, granule=128):
    """Largest multiple of `granule` <= target that divides `padded`.

    `padded` is always a multiple of `granule`, so this terminates (worst
    case: granule)."""
    t = max((min(target, padded) // granule) * granule, granule)
    while padded % t:
        t -= granule
    return t


# ------------------------------ kernels ----------------------------------------

def _noisy_train_acc_kernel(x_ref, wmu_ref, wsig_ref, ein_ref, eout_ref, b_ref,
                            o_ref, acc_mu, acc_sig, *, mxu_dtype):
    """3-D grid (i, j, k): K-tiled training forward with two f32 accumulators."""
    k = pl.program_id(2)
    x = x_ref[...]                                   # [tm, tk] f32
    xs = x * ein_ref[...]                            # f32 VPU (v5e-safe)
    d_mu = jnp.dot(x.astype(mxu_dtype), wmu_ref[...],
                   preferred_element_type=jnp.float32)
    d_sig = jnp.dot(xs.astype(mxu_dtype), wsig_ref[...],
                    preferred_element_type=jnp.float32)

    @pl.when(k == 0)
    def _():                                         # no zero-init round-trip
        acc_mu[...] = d_mu
        acc_sig[...] = d_sig

    @pl.when(k != 0)
    def _():
        acc_mu[...] += d_mu
        acc_sig[...] += d_sig

    @pl.when(k == pl.num_programs(2) - 1)
    def _():                                         # eps_out applied once here
        o_ref[...] = (acc_mu[...] + eout_ref[...] * acc_sig[...]
                      + b_ref[...]).astype(o_ref.dtype)


def _noisy_train_direct_kernel(x_ref, wmu_ref, wsig_ref, ein_ref, eout_ref,
                               b_ref, o_ref, *, mxu_dtype):
    """2-D grid (i, j): whole K in one tile, no scratch, straight store."""
    x = x_ref[...]
    xs = x * ein_ref[...]
    y = jnp.dot(x.astype(mxu_dtype), wmu_ref[...],
                preferred_element_type=jnp.float32)
    y += eout_ref[...] * jnp.dot(xs.astype(mxu_dtype), wsig_ref[...],
                                 preferred_element_type=jnp.float32)
    o_ref[...] = (y + b_ref[...]).astype(o_ref.dtype)


def _linear_acc_kernel(x_ref, w_ref, b_ref, o_ref, acc, *, mxu_dtype):
    """Eval path (K-tiled): plain y = x @ Wmu + b_mu."""
    k = pl.program_id(2)
    d = jnp.dot(x_ref[...].astype(mxu_dtype), w_ref[...],
                preferred_element_type=jnp.float32)

    @pl.when(k == 0)
    def _():
        acc[...] = d

    @pl.when(k != 0)
    def _():
        acc[...] += d

    @pl.when(k == pl.num_programs(2) - 1)
    def _():
        o_ref[...] = (acc[...] + b_ref[...]).astype(o_ref.dtype)


def _linear_direct_kernel(x_ref, w_ref, b_ref, o_ref, *, mxu_dtype):
    """Eval path (single K tile)."""
    y = jnp.dot(x_ref[...].astype(mxu_dtype), w_ref[...],
                preferred_element_type=jnp.float32)
    o_ref[...] = (y + b_ref[...]).astype(o_ref.dtype)


# ------------------------------ wrapper -----------------------------------------

def noisy_linear_pallas(x, wmu_t_p, wsig_t_p, eps_in, eps_out, bias_mu,
                        bias_sigma, *, training=True, tm=256, tn=512, tk=512):
    """Fused NoisyLinear forward.

    Args:
      x:              [B, in_features]  f32 activations.
      wmu_t_p:        [Kp, Np] pre-transposed, pre-padded weight_mu (bf16/f32).
      wsig_t_p:       [Kp, Np] pre-transposed, pre-padded weight_sigma.
      eps_in:         [in_features]  factorized noise (epsilon_in).
      eps_out:        [out_features] factorized noise (epsilon_out == bias_epsilon).
      bias_mu/sigma:  [out_features].
    Matches F.linear(x, mu + sigma*outer(eps_out, eps_in), b_mu + b_sig*eps_out)
    in training, and F.linear(x, mu, b_mu) in eval.
    """
    B, K = x.shape
    N = bias_mu.shape[0]
    Kp, Np = wmu_t_p.shape
    assert wsig_t_p.shape == (Kp, Np)
    assert Kp >= K and Np >= N and Kp % 128 == 0 and Np % 128 == 0

    mxu_dtype = wmu_t_p.dtype

    tn = _pick_tile(tn, Np)
    tk = _pick_tile(tk, Kp)
    tm = min(tm, _round_up(B, 8))
    Bp = _round_up(B, tm)

    # Per-call pads are only the activations and O(K)/O(N) vectors.
    xp = jnp.pad(x, ((0, Bp - B), (0, Kp - K)))
    b_eff = bias_mu + bias_sigma * eps_out if training else bias_mu
    b_p = jnp.pad(b_eff, (0, Np - N)).reshape(1, Np)

    grid_m, grid_n, grid_k = Bp // tm, Np // tn, Kp // tk
    out_shape = jax.ShapeDtypeStruct((Bp, Np), x.dtype)

    n_mm = 2 if training else 1
    cost = pl.CostEstimate(
        flops=int(2 * B * K * N * n_mm),
        transcendentals=0,
        bytes_accessed=int(Kp * Np * mxu_dtype.itemsize * n_mm
                           + Bp * Kp * 4 + Bp * Np * 4))

    if grid_k == 1:
        # ---- small-layer fast path: 2-D grid, no scratch, no reduction axis.
        grid = (grid_m, grid_n)
        x_spec = pl.BlockSpec((tm, Kp), lambda i, j: (i, 0))
        w_spec = pl.BlockSpec((Kp, tn), lambda i, j: (0, j))
        kvec_spec = pl.BlockSpec((1, Kp), lambda i, j: (0, 0))
        nvec_spec = pl.BlockSpec((1, tn), lambda i, j: (0, j))
        out_spec = pl.BlockSpec((tm, tn), lambda i, j: (i, j))
        cparams = pltpu.CompilerParams(
            dimension_semantics=("parallel", "parallel"))

        if training:
            ein_p = jnp.pad(eps_in, (0, Kp - K)).reshape(1, Kp)
            eout_p = jnp.pad(eps_out, (0, Np - N)).reshape(1, Np)
            yp = pl.pallas_call(
                functools.partial(_noisy_train_direct_kernel,
                                  mxu_dtype=mxu_dtype),
                out_shape=out_shape, grid=grid,
                in_specs=[x_spec, w_spec, w_spec, kvec_spec, nvec_spec,
                          nvec_spec],
                out_specs=out_spec,
                compiler_params=cparams, cost_estimate=cost,
            )(xp, wmu_t_p, wsig_t_p, ein_p, eout_p, b_p)
        else:
            yp = pl.pallas_call(
                functools.partial(_linear_direct_kernel, mxu_dtype=mxu_dtype),
                out_shape=out_shape, grid=grid,
                in_specs=[x_spec, w_spec, nvec_spec],
                out_specs=out_spec,
                compiler_params=cparams, cost_estimate=cost,
            )(xp, wmu_t_p, b_p)
    else:
        # ---- K-tiled path: 3-D grid, f32 VMEM accumulator(s).
        grid = (grid_m, grid_n, grid_k)
        x_spec = pl.BlockSpec((tm, tk), lambda i, j, k: (i, k))
        w_spec = pl.BlockSpec((tk, tn), lambda i, j, k: (k, j))
        kvec_spec = pl.BlockSpec((1, tk), lambda i, j, k: (0, k))
        nvec_spec = pl.BlockSpec((1, tn), lambda i, j, k: (0, j))
        out_spec = pl.BlockSpec((tm, tn), lambda i, j, k: (i, j))
        cparams = pltpu.CompilerParams(
            dimension_semantics=("parallel", "parallel", "arbitrary"))

        if training:
            ein_p = jnp.pad(eps_in, (0, Kp - K)).reshape(1, Kp)
            eout_p = jnp.pad(eps_out, (0, Np - N)).reshape(1, Np)
            yp = pl.pallas_call(
                functools.partial(_noisy_train_acc_kernel,
                                  mxu_dtype=mxu_dtype),
                out_shape=out_shape, grid=grid,
                in_specs=[x_spec, w_spec, w_spec, kvec_spec, nvec_spec,
                          nvec_spec],
                out_specs=out_spec,
                scratch_shapes=[pltpu.VMEM((tm, tn), jnp.float32),
                                pltpu.VMEM((tm, tn), jnp.float32)],
                compiler_params=cparams, cost_estimate=cost,
            )(xp, wmu_t_p, wsig_t_p, ein_p, eout_p, b_p)
        else:
            yp = pl.pallas_call(
                functools.partial(_linear_acc_kernel, mxu_dtype=mxu_dtype),
                out_shape=out_shape, grid=grid,
                in_specs=[x_spec, w_spec, nvec_spec],
                out_specs=out_spec,
                scratch_shapes=[pltpu.VMEM((tm, tn), jnp.float32)],
                compiler_params=cparams, cost_estimate=cost,
            )(xp, wmu_t_p, b_p)

    return yp[:B, :N]


# --------------- parameter / noise construction (plain JAX glue) ----------------

def scale_noise(key, size):
    # torch: x = randn(size); x.sign() * x.abs().sqrt()
    x = jax.random.normal(key, (size,), dtype=jnp.float32)
    return jnp.sign(x) * jnp.sqrt(jnp.abs(x))


def init_noisy_linear(key, in_features, out_features, std_init=0.4):
    """PyTorch-layout parameters + factorized noise (reset_parameters/reset_noise)."""
    k_wmu, k_bmu, k_ein, k_eout = jax.random.split(key, 4)
    mu_range = 1.0 / (in_features ** 0.5)
    return dict(
        weight_mu=jax.random.uniform(k_wmu, (out_features, in_features),
                                     jnp.float32, -mu_range, mu_range),
        weight_sigma=jnp.full((out_features, in_features),
                              std_init / (in_features ** 0.5), jnp.float32),
        bias_mu=jax.random.uniform(k_bmu, (out_features,), jnp.float32,
                                   -mu_range, mu_range),
        bias_sigma=jnp.full((out_features,),
                            std_init / (out_features ** 0.5), jnp.float32),
        eps_in=scale_noise(k_ein, in_features),     # epsilon_in
        eps_out=scale_noise(k_eout, out_features),  # epsilon_out == bias_epsilon
    )


def prepare_noisy_linear_params(weight_mu, weight_sigma, *,
                                weights_dtype=jnp.bfloat16):
    """One-time prep (after init / after each optimizer step, NOT per forward):
    transpose [N,K] -> [K,N], cast (default bf16), zero-pad to multiples of 128."""
    N, K = weight_mu.shape
    Kp, Np = _round_up(K, 128), _round_up(N, 128)

    def prep(w):
        wt = w.T.astype(weights_dtype)
        return jnp.pad(wt, ((0, Kp - K), (0, Np - N)))

    return prep(weight_mu), prep(weight_sigma)


def noisy_linear_ref(x, p, training=True):
    """Reference == the PyTorch forward (dense epsilon materialized, f32)."""
    if training:
        w_eps = jnp.outer(p["eps_out"], p["eps_in"])     # epsilon_out.ger(epsilon_in)
        w = p["weight_mu"] + p["weight_sigma"] * w_eps
        b = p["bias_mu"] + p["bias_sigma"] * p["eps_out"]
    else:
        w, b = p["weight_mu"], p["bias_mu"]
    return jnp.dot(x, w.T, precision=jax.lax.Precision.HIGHEST) + b


# ------------------------------------ demo ---------------------------------------

if __name__ == "__main__":
    key = jax.random.PRNGKey(0)
    ks = jax.random.split(key, 6)

    run_train = jax.jit(functools.partial(noisy_linear_pallas, training=True))
    run_eval = jax.jit(functools.partial(noisy_linear_pallas, training=False))

    # ---- Case 1: aligned small layer, bf16 weights, single-K-tile fast path.
    B, K, N = 4, 128, 128
    p = init_noisy_linear(ks[0], K, N)
    x = jax.random.normal(ks[1], (B, K), dtype=jnp.float32)
    wmu_p, wsig_p = prepare_noisy_linear_params(p["weight_mu"], p["weight_sigma"])

    y = jax.block_until_ready(run_train(
        x, wmu_p, wsig_p, p["eps_in"], p["eps_out"], p["bias_mu"], p["bias_sigma"]))
    assert y.shape == (B, N)
    assert jnp.allclose(y, noisy_linear_ref(x, p, True), atol=3e-2, rtol=3e-2), \
        "train-mode (bf16) mismatch vs reference"

    y_ev = jax.block_until_ready(run_eval(
        x, wmu_p, wsig_p, p["eps_in"], p["eps_out"], p["bias_mu"], p["bias_sigma"]))
    assert jnp.allclose(y_ev, noisy_linear_ref(x, p, False), atol=3e-2, rtol=3e-2), \
        "eval-mode (bf16) mismatch vs reference"

    # ---- Case 2: f32 weights, forced small tiles -> exercises the K-tiled
    #      accumulator kernels (grid_k == 2).
    B2, K2, N2 = 8, 256, 256
    p2 = init_noisy_linear(ks[2], K2, N2)
    x2 = jax.random.normal(ks[3], (B2, K2), dtype=jnp.float32)
    wmu2, wsig2 = prepare_noisy_linear_params(p2["weight_mu"], p2["weight_sigma"],
                                              weights_dtype=jnp.float32)
    run_train_kt = jax.jit(functools.partial(noisy_linear_pallas, training=True,
                                             tm=8, tn=128, tk=128))
    run_eval_kt = jax.jit(functools.partial(noisy_linear_pallas, training=False,
                                            tm=8, tn=128, tk=128))
    y2 = jax.block_until_ready(run_train_kt(
        x2, wmu2, wsig2, p2["eps_in"], p2["eps_out"], p2["bias_mu"], p2["bias_sigma"]))
    assert jnp.allclose(y2, noisy_linear_ref(x2, p2, True), atol=1e-2, rtol=1e-2), \
        "K-tiled train-mode mismatch vs reference"
    y2e = jax.block_until_ready(run_eval_kt(
        x2, wmu2, wsig2, p2["eps_in"], p2["eps_out"], p2["bias_mu"], p2["bias_sigma"]))
    assert jnp.allclose(y2e, noisy_linear_ref(x2, p2, False), atol=1e-2, rtol=1e-2), \
        "K-tiled eval-mode mismatch vs reference"

    # ---- Case 3: ragged / unaligned shapes exercise the padding path.
    B3, K3, N3 = 5, 40, 24
    p3 = init_noisy_linear(ks[4], K3, N3)
    x3 = jax.random.normal(ks[5], (B3, K3), dtype=jnp.float32)
    wmu3, wsig3 = prepare_noisy_linear_params(p3["weight_mu"], p3["weight_sigma"])
    y3 = jax.block_until_ready(run_train(
        x3, wmu3, wsig3, p3["eps_in"], p3["eps_out"], p3["bias_mu"], p3["bias_sigma"]))
    assert y3.shape == (B3, N3)
    assert jnp.allclose(y3, noisy_linear_ref(x3, p3, True), atol=3e-2, rtol=3e-2), \
        "ragged-shape mismatch vs reference"

    print("KERNEL_OK")
</pallas_src>

<mosaic_0001>
module attributes {stable_mosaic.version = 11 : i64} {
  func.func @_noisy_train_direct_kernel(%arg0: i32, %arg1: i32, %arg2: memref<8x128xf32, #tpu.memory_space<vmem>>, %arg3: memref<128x128xbf16, #tpu.memory_space<vmem>>, %arg4: memref<128x128xbf16, #tpu.memory_space<vmem>>, %arg5: memref<1x128xf32, #tpu.memory_space<vmem>>, %arg6: memref<1x128xf32, #tpu.memory_space<vmem>>, %arg7: memref<1x128xf32, #tpu.memory_space<vmem>>, %arg8: memref<8x128xf32, #tpu.memory_space<vmem>>) attributes {dimension_semantics = [#tpu.dimension_semantics<parallel>, #tpu.dimension_semantics<parallel>], iteration_bounds = array<i64: 1, 1>, scalar_prefetch = 0 : i64, scratch_operands = 0 : i64, tpu.core_type = #tpu.core_type<tc>, window_params = [{transform_indices = @transform_0, window_bounds = array<i64: 8, 128>}, {transform_indices = @transform_1, window_bounds = array<i64: 128, 128>}, {transform_indices = @transform_2, window_bounds = array<i64: 128, 128>}, {pipeline_mode = #tpu.pipeline_mode<synchronous>, transform_indices = @transform_3, window_bounds = array<i64: 1, 128>}, {transform_indices = @transform_4, window_bounds = array<i64: 1, 128>}, {transform_indices = @transform_5, window_bounds = array<i64: 1, 128>}, {transform_indices = @transform_6, window_bounds = array<i64: 8, 128>}]} {
    %c0 = arith.constant 0 : index
    %c0_0 = arith.constant 0 : index
    %0 = vector.load %arg2[%c0, %c0_0] : memref<8x128xf32, #tpu.memory_space<vmem>>, vector<8x128xf32>
    %c0_1 = arith.constant 0 : index
    %c0_2 = arith.constant 0 : index
    %1 = vector.load %arg5[%c0_1, %c0_2] : memref<1x128xf32, #tpu.memory_space<vmem>>, vector<1x128xf32>
    %2 = vector.broadcast %1 : vector<1x128xf32> to vector<8x128xf32>
    %3 = arith.mulf %0, %2 : vector<8x128xf32>
    %4 = arith.truncf %0 : vector<8x128xf32> to vector<8x128xbf16>
    %c0_3 = arith.constant 0 : index
    %c0_4 = arith.constant 0 : index
    %5 = vector.load %arg3[%c0_3, %c0_4] : memref<128x128xbf16, #tpu.memory_space<vmem>>, vector<128x128xbf16>
    %cst = arith.constant dense<0.000000e+00> : vector<8x128xf32>
    %6 = tpu.matmul %4, %5, %cst {dimension_numbers = #tpu.dot_dimension_numbers<[1], [0], [0], [1], [0, 0, 1, 1], [], []>} : vector<8x128xbf16>, vector<128x128xbf16>, vector<8x128xf32> -> vector<8x128xf32>
    %c0_5 = arith.constant 0 : index
    %c0_6 = arith.constant 0 : index
    %7 = vector.load %arg6[%c0_5, %c0_6] : memref<1x128xf32, #tpu.memory_space<vmem>>, vector<1x128xf32>
    %8 = arith.truncf %3 : vector<8x128xf32> to vector<8x128xbf16>
    %c0_7 = arith.constant 0 : index
    %c0_8 = arith.constant 0 : index
    %9 = vector.load %arg4[%c0_7, %c0_8] : memref<128x128xbf16, #tpu.memory_space<vmem>>, vector<128x128xbf16>
    %cst_9 = arith.constant dense<0.000000e+00> : vector<8x128xf32>
    %10 = tpu.matmul %8, %9, %cst_9 {dimension_numbers = #tpu.dot_dimension_numbers<[1], [0], [0], [1], [0, 0, 1, 1], [], []>} : vector<8x128xbf16>, vector<128x128xbf16>, vector<8x128xf32> -> vector<8x128xf32>
    %11 = vector.broadcast %7 : vector<1x128xf32> to vector<8x128xf32>
    %12 = arith.mulf %11, %10 : vector<8x128xf32>
    %13 = arith.addf %6, %12 : vector<8x128xf32>
    %c0_10 = arith.constant 0 : index
    %c0_11 = arith.constant 0 : index
    %14 = vector.load %arg7[%c0_10, %c0_11] : memref<1x128xf32, #tpu.memory_space<vmem>>, vector<1x128xf32>
    %15 = vector.broadcast %14 : vector<1x128xf32> to vector<8x128xf32>
    %16 = arith.addf %13, %15 : vector<8x128xf32>
    %c0_12 = arith.constant 0 : index
    %c0_13 = arith.constant 0 : index
    %17 = vector.load %arg8[%c0_12, %c0_13] : memref<8x128xf32, #tpu.memory_space<vmem>>, vector<8x128xf32>
    tpu.vector_store %arg8[%c0_12, %c0_13], %16 {strides = array<i32>} : memref<8x128xf32, #tpu.memory_space<vmem>>, vector<8x128xf32>,
    return
  }
  func.func @transform_0(%arg0: i32, %arg1: i32) -> (i32, i32) {
    %c0_i32 = arith.constant 0 : i32
    %c0_i32_0 = arith.constant 0 : i32
    return %arg0, %c0_i32 : i32, i32
  }
  func.func @transform_1(%arg0: i32, %arg1: i32) -> (i32, i32) {
    %c0_i32 = arith.constant 0 : i32
    %c0_i32_0 = arith.constant 0 : i32
    return %c0_i32, %arg1 : i32, i32
  }
  func.func @transform_2(%arg0: i32, %arg1: i32) -> (i32, i32) {
    %c0_i32 = arith.constant 0 : i32
    %c0_i32_0 = arith.constant 0 : i32
    return %c0_i32, %arg1 : i32, i32
  }
  func.func @transform_3(%arg0: i32, %arg1: i32) -> (i32, i32) {
    %c0_i32 = arith.constant 0 : i32
    %c0_i32_0 = arith.constant 0 : i32
    %c0_i32_1 = arith.constant 0 : i32
    return %c0_i32, %c0_i32_0 : i32, i32
  }
  func.func @transform_4(%arg0: i32, %arg1: i32) -> (i32, i32) {
    %c0_i32 = arith.constant 0 : i32
    %c0_i32_0 = arith.constant 0 : i32
    return %c0_i32, %arg1 : i32, i32
  }
  func.func @transform_5(%arg0: i32, %arg1: i32) -> (i32, i32) {
    %c0_i32 = arith.constant 0 : i32
    %c0_i32_0 = arith.constant 0 : i32
    return %c0_i32, %arg1 : i32, i32
  }
  func.func @transform_6(%arg0: i32, %arg1: i32) -> (i32, i32) {
    %c0_i32 = arith.constant 0 : i32
    return %arg0, %arg1 : i32, i32
  }
}

</mosaic_0001>

<bundles_post_ra>
// kernel: noisy_linear_pallas.1
= control target key start
LH: loop header
LB: loop body
LE: loop exit
PB: predicated region body
PF: predicated region fallthrough
CT: control target
= control target key end

     0   :  { %11 = vsyncpa [#allocation3], 0  ;;  %s521_s0 = inlined_call_operand.vmem [shape: f32[8,128], index: 0, kind: input, shape index: {}]   ;;  %s522_s1 = inlined_call_operand.hbm [shape: bf16[128,128], index: 1, kind: input, shape index: {}]   ;;  %s523_s2 = inlined_call_operand.hbm [shape: bf16[128,128], index: 2, kind: input, shape index: {}]   ;;  %s524_s3 = inlined_call_operand.vmem [shape: f32[1,128], index: 3, kind: input, shape index: {}]   ;;  %s525_s4 = inlined_call_operand.vmem [shape: f32[1,128], index: 4, kind: input, shape index: {}]   ;;  %s526_s5 = inlined_call_operand.vmem [shape: f32[1,128], index: 5, kind: input, shape index: {}]   ;;  %s527_s6 = inlined_call_operand.vmem [shape: f32[8,128], index: 6, kind: output, shape index: {}]  }
   0x1   :  { %12 = vsyncpa [#allocation5], 0  ;;  %s441_s21 = smov [#allocation2]   ;;  %s393_s25 = scalar_lea.hbm %s522_s1, 1024 }
   0x2   :  { %s20_s22 = sshll.u32 %s441_s21, 4  ;;  %p394_p0 = scmp.ne.s32.totalorder %s522_s1, %s393_s25  ;;  %s21_s22 = int_to_ptr.vmem [resolvable:$true] %s20_s22 }
   0x3   :  { %p397_p1 = scmp.lt.u32.totalorder %s393_s25, %s522_s1 }
   0x5   :  { %p399_p2 = pnand %p397_p1, %p394_p0 }
   0x7   :  { %402 = shalt.err (!%p399_p2)
}
   0x8   :  { %s403_s30 = scalar_lea.vmem %s21_s22, 1024  ;;  %p408_p4 = scmp.lt.s32.totalorder %s21_s22, %s21_s22 }
   0x9   :  { %p404_p3 = scmp.ne.s32.totalorder %s21_s22, %s403_s30  ;;  %p409_p5 = scmp.lt.s32.totalorder %s403_s30, %s403_s30 }
   0xb   :  { %p410_p6 = por %p409_p5, %p408_p4 }
   0xd   :  { %p411_p7 = pnand %p410_p6, %p404_p3 }
   0xf   :  { %414 = shalt.err (!%p411_p7)
}
  0x10   :  { %s442_s7 = smov 64   ;;  %s443_s8 = smov 4  }
  0x11   :  { %26 = dma.hbm_to_vmem [thread:$0]  %s522_s1, 1024, %s21_s22, [#allocation3], %s442_s7, %s442_s7, %s443_s8  }
  0x12   :  { %s444_s11 = smov [#allocation4]   ;;  %s415_s15 = scalar_lea.hbm %s523_s2, 1024 }
  0x13   :  { %s32_s12 = sshll.u32 %s444_s11, 4  ;;  %p416_p8 = scmp.ne.s32.totalorder %s523_s2, %s415_s15  ;;  %s33_s12 = int_to_ptr.vmem [resolvable:$true] %s32_s12 }
  0x14   :  { %p419_p9 = scmp.lt.u32.totalorder %s415_s15, %s523_s2 }
  0x16   :  { %p421_p10 = pnand %p419_p9, %p416_p8 }
  0x18   :  { %424 = shalt.err (!%p421_p10)
}
  0x19   :  { %s425_s20 = scalar_lea.vmem %s33_s12, 1024  ;;  %p430_p12 = scmp.lt.s32.totalorder %s33_s12, %s33_s12 }
  0x1a   :  { %p426_p11 = scmp.ne.s32.totalorder %s33_s12, %s425_s20  ;;  %p431_p13 = scmp.lt.s32.totalorder %s425_s20, %s425_s20 }
  0x1c   :  { %p432_p0 = por %p431_p13, %p430_p12 }
  0x1e   :  { %p433_p1 = pnand %p432_p0, %p426_p11 }
  0x20   :  { %436 = shalt.err (!%p433_p1)
}
  0x21   :  { %38 = dma.hbm_to_vmem [thread:$0]  %s523_s2, 1024, %s33_s12, [#allocation5], %s442_s7, %s442_s7, %s443_s8  }
  0x22   :  { %437 = dma.done.wait [#allocation3], 1024  }
  0x23   :  { %438 = vsyncadd [#allocation3], 4294966272 }
  0x24   :  { %439 = dma.done.wait [#allocation5], 1024  }
  0x25   :  { %440 = vsyncadd [#allocation5], 4294966272  ;;  %v445_v0 = vmov 0.0   ;;  %vm446_vm0 = vmmov 0   ;;  %v377_v1 = vld [vmem:[#allocation4] sm:$0xff]   ;;  %v379_v3 = vld [vmem:[#allocation4 + $0x8] sm:$0xff]  }
  0x26   :  { %331 = vmatprep.subr.bf16.mxu0 %v445_v0  ;;  %351 = vmatprep.subr.bf16.mxu1 %v445_v0  ;;  %v378_v2 = vld [vmem:[#allocation2] sm:$0xff]   ;;  %v380_v4 = vld [vmem:[#allocation2 + $0x8] sm:$0xff]   ;;  %v381_v5 = vld [vmem:[#allocation4 + $0x10] sm:$0xff]  }
  0x27   :  { %347 = vmatprep.mubr.msk.bf16.mxu0 %vm446_vm0, %v445_v0  ;;  %367 = vmatprep.mubr.msk.bf16.mxu1 %vm446_vm0, %v445_v0  ;;  %v382_v6 = vld [vmem:[#allocation2 + $0x10] sm:$0xff]   ;;  %v383_v7 = vld [vmem:[#allocation4 + $0x18] sm:$0xff]   ;;  %v385_v9 = vld [vmem:[#allocation4 + $0x20] sm:$0xff]  }
  0x28   :  { %332 = vmatpush3.bf16.msra.mxu0 %v377_v1  ;;  %352 = vmatpush3.bf16.msra.mxu1 %v378_v2  ;;  %v384_v8 = vld [vmem:[#allocation2 + $0x18] sm:$0xff]   ;;  %v386_v10 = vld [vmem:[#allocation2 + $0x20] sm:$0xff]   ;;  %v387_v11 = vld [vmem:[#allocation4 + $0x28] sm:$0xff]  }
  0x29   :  { %333 = vmatprep.subr.bf16.mxu0 %v445_v0  ;;  %353 = vmatprep.subr.bf16.mxu1 %v445_v0  ;;  %v388_v12 = vld [vmem:[#allocation2 + $0x28] sm:$0xff]   ;;  %v389_v13 = vld [vmem:[#allocation4 + $0x30] sm:$0xff]   ;;  %v52_v14 = vld [vmem:[%s521_s0] sm:$0xff] }
  0x2a   :  { %v294_v15 = vld [vmem:[%s524_s3] ss:$0 sm:$0xff]  ;;  %v390_v16 = vld [vmem:[#allocation2 + $0x30] sm:$0xff]   ;;  %v391_v18 = vld [vmem:[#allocation4 + $0x38] sm:$0xff]   ;;  %v61_v21 = vpack.c.bf16 %v52_v14, %v52_v14 }
  0x2b   :  { %v60_v17 = vmul.f32 %v294_v15, %v52_v14  ;;  %v392_v19 = vld [vmem:[#allocation2 + $0x38] sm:$0xff]   ;;  %v303_v22 = vld [vmem:[%s525_s4] ss:$0 sm:$0xff] }
  0x2c   :  { %334 = vmatpush3.bf16.msra.mxu0 %v379_v3  ;;  %354 = vmatpush3.bf16.msra.mxu1 %v380_v4  ;;  %v312_v27 = vld [vmem:[%s526_s5] ss:$0 sm:$0xff] }
  0x2d   :  { %335 = vmatprep.subr.bf16.mxu0 %v445_v0  ;;  %355 = vmatprep.subr.bf16.mxu1 %v445_v0  ;;  %v79_v20 = vpack.c.bf16 %v60_v17, %v60_v17 }
  0x30   :  { %336 = vmatpush3.bf16.msra.mxu0 %v381_v5  ;;  %356 = vmatpush3.bf16.msra.mxu1 %v382_v6 }
  0x31   :  { %337 = vmatprep.subr.bf16.mxu0 %v445_v0  ;;  %357 = vmatprep.subr.bf16.mxu1 %v445_v0 }
  0x34   :  { %338 = vmatpush3.bf16.msra.mxu0 %v383_v7  ;;  %358 = vmatpush3.bf16.msra.mxu1 %v384_v8 }
  0x35   :  { %339 = vmatprep.subr.bf16.mxu0 %v445_v0  ;;  %359 = vmatprep.subr.bf16.mxu1 %v445_v0 }
  0x38   :  { %340 = vmatpush3.bf16.msra.mxu0 %v385_v9  ;;  %360 = vmatpush3.bf16.msra.mxu1 %v386_v10 }
  0x39   :  { %341 = vmatprep.subr.bf16.mxu0 %v445_v0  ;;  %361 = vmatprep.subr.bf16.mxu1 %v445_v0 }
  0x3c   :  { %342 = vmatpush3.bf16.msra.mxu0 %v387_v11  ;;  %362 = vmatpush3.bf16.msra.mxu1 %v388_v12 }
  0x3d   :  { %343 = vmatprep.subr.bf16.mxu0 %v445_v0  ;;  %363 = vmatprep.subr.bf16.mxu1 %v445_v0 }
  0x40   :  { %344 = vmatpush3.bf16.msra.mxu0 %v389_v13  ;;  %364 = vmatpush3.bf16.msra.mxu1 %v390_v16 }
  0x41   :  { %345 = vmatprep.subr.bf16.mxu0 %v445_v0  ;;  %365 = vmatprep.subr.bf16.mxu1 %v445_v0 }
  0x44   :  { %346 = vmatpush3.bf16.msra.mxu0 %v391_v18  ;;  %366 = vmatpush3.bf16.msra.mxu1 %v392_v19 }
  0x47   :  { %348 = vmatmul.mubr.bf16.vlgmr.msra.gmra.mrb[0].mxu0 %v79_v20  ;;  %368 = vmatmul.mubr.bf16.vlgmr.msra.gmra.mrb[0].mxu1 %v61_v21 }
 0x11a   :  { %v178_v23 = vpop.f32.mrb[0].mxu0  ;;  %v273_v25 = vpop.f32.mrb[0].mxu1 }
 0x11b   :  { %v190_v24 = vmul.f32 %v303_v22, %v178_v23  ;;  %v349_v26 = vpop.f32.mrb[1].mxu0  ;;  %v369_v28 = vpop.f32.mrb[1].mxu1 }
 0x11c   :  { %v181_v29 = vpop.f32.mrb[2].mxu0  ;;  %v276_v31 = vpop.f32.mrb[2].mxu1 }
 0x11d   :  { %v274_v30 = vadd.f32 %v273_v25, %v190_v24  ;;  %v350_v32 = vpop.f32.mrb[3].mxu0  ;;  %v370_v33 = vpop.f32.mrb[3].mxu1 }
 0x11f   :  { %v286_v34 = vadd.f32 %v312_v27, %v274_v30 }
 0x121   :  { %287 = vst [vmem:[%s527_s6] sm:$0xff] %v286_v34 }
 0x122   :  { %292 = vsyncpa [#allocation3], 1 }
 0x123   :  { %293 = vsyncpa [#allocation5], 1 }

</bundles_post_ra>
